<compile_context>
chip_gen: v7x
topology: tpu7x:2x2x1
jax: 0.10.0
libtpu: 0.0.40
codegen_flags: <defaults>
</compile_context>

<pallas_src>
import functools

import jax
import jax.numpy as jnp
import numpy as np
from jax import lax
from jax.experimental import pallas as pl
from jax.experimental.pallas import tpu as pltpu


# ---------------------------------------------------------------------------
# Tunables
# ---------------------------------------------------------------------------

# Take the single fused block whenever enc fits comfortably in scoped VMEM.
_SINGLE_BLOCK_ENC_BYTES = 8 * 1024 * 1024
# Streaming path: target ~3 MiB of enc per grid step so DMA time dominates the
# per-step overhead on every generation (v5e 0.82, v6e ~1.4, v7x 3.2 TB/s).
_STREAM_TILE_TARGET_BYTES = 3 * 1024 * 1024
_STREAM_TILE_MIN = 1024
_STREAM_TILE_MAX = 16 * 1024
# 2 double-buffered enc tiles never exceed this, even for very wide H.
_STREAM_DOUBLE_BUF_CAP_BYTES = 12 * 1024 * 1024
# Raise scoped VMEM a bit (v5e default is 16 MiB); well under the smallest
# physical VMEM (v7x: 64 MiB).
_VMEM_LIMIT_BYTES = 32 * 1024 * 1024


# ---------------------------------------------------------------------------
# Kernels
# ---------------------------------------------------------------------------

def _dot_fused_kernel(dec_ref, enc_ref, aw_ref, law_ref):
    """Single-block path (whole enc in one VMEM block): scores + softmax.

    dec_ref : [B, H]   decoder state(s), lane-dense rows
    enc_ref : [L, H]   encoder outputs
    aw_ref  : [B, L]   softmax(scores, axis=1)
    law_ref : [B, L]   log_softmax(scores + 1e-6, axis=1) (== log_softmax(scores))
    """
    s = lax.dot_general(dec_ref[...], enc_ref[...],
                        dimension_numbers=(((1,), (1,)), ((), ())),
                        preferred_element_type=jnp.float32)      # [B, L]
    m = jnp.max(s, axis=1, keepdims=True)
    e = jnp.exp(s - m)
    den = jnp.sum(e, axis=1, keepdims=True)
    aw_ref[...] = e / den
    law_ref[...] = (s - m) - jnp.log(den)


def _dot_stream_kernel(dec_ref, enc_ref, aw_ref, law_ref, s_ref, *, length, tile):
    """Fused streaming path: per-tile scores into a resident scratch, global
    softmax epilogue on the last tile.

    dec_ref : [B, H]          resident decoder rows
    enc_ref : [tile, H]       streamed enc tile (auto double-buffered)
    aw_ref  : [nt, B, tile]   resident output (whole array, written in epilogue)
    law_ref : [nt, B, tile]   resident output (whole array, written in epilogue)
    s_ref   : [nt, B, tile]   VMEM scratch holding all partial score rows
    """
    i = pl.program_id(0)
    nt = pl.num_programs(0)

    s = lax.dot_general(dec_ref[...], enc_ref[...],
                        dimension_numbers=(((1,), (1,)), ((), ())),
                        preferred_element_type=jnp.float32)      # [B, tile]

    @pl.when(i < nt - 1)
    def _():
        s_ref[i] = s

    @pl.when(i == nt - 1)
    def _():
        if length % tile != 0:
            # Load-bearing mask: the boundary tile's padded enc rows hold
            # unspecified data; keep them out of the fused row max / sum.
            lane = lax.broadcasted_iota(jnp.int32, s.shape, 1) + i * tile
            s_ref[i] = jnp.where(lane < length, s, -jnp.inf)
        else:
            s_ref[i] = s

        # Global softmax / log_softmax over all resident scores.
        sv = s_ref[...]                                          # [nt, B, tile]
        m = jnp.max(jnp.max(sv, axis=2, keepdims=True),
                    axis=0, keepdims=True)                       # [1, B, 1]
        e = jnp.exp(sv - m)
        den = jnp.sum(jnp.sum(e, axis=2, keepdims=True),
                      axis=0, keepdims=True)                     # [1, B, 1]
        # Exact division (one-time epilogue); approx reciprocal risks the
        # 2e-5-class tolerance for no measurable gain here.
        aw_ref[...] = e / den
        law_ref[...] = (sv - m) - jnp.log(den)


# ---------------------------------------------------------------------------
# Wrapper
# ---------------------------------------------------------------------------

def _stream_tile_rows(hidden, itemsize):
    bytes_per_row = hidden * itemsize
    rows = _STREAM_TILE_TARGET_BYTES // bytes_per_row
    rows = max(_STREAM_TILE_MIN, min(_STREAM_TILE_MAX, rows))
    hard_cap = max(128, _STREAM_DOUBLE_BUF_CAP_BYTES // (2 * bytes_per_row))
    rows = min(rows, hard_cap)
    return max(128, (int(rows) // 128) * 128)


def pointer_atten(atten_model, encoder_outputs, cur_decoder_output,
                  w1=None, w2=None):
    """JAX/Pallas equivalent of PointerAtten.forward.

    encoder_outputs    : [L, H]
    cur_decoder_output : [H]  (module semantics)  or  [B, H]  (batched queries)
    w1 [H, H], w2 [1, H] : accepted for API compatibility but never touched at
        runtime -- in Biaffine mode the softmax/log_softmax reduce over a
        size-1 axis, so the outputs are constants and the matmuls are dead.
    returns (atten_weights, log_atten_weights), each [B, L] float32 (B=1 for
    the 1-D decoder input, matching the module's [1, L]).
    """
    assert atten_model in ("Biaffine", "Dotproduct")
    enc = jnp.asarray(encoder_outputs)
    L, H = enc.shape

    if atten_model == "Biaffine":
        # torch: softmax(bi_affine, 0) / log_softmax(bi_affine + 1e-6, 0) on a
        # [1, L] tensor -> reduction axis has size 1 -> exactly 1.0 / 0.0.
        return jnp.ones((1, L), jnp.float32), jnp.zeros((1, L), jnp.float32)

    dec = jnp.asarray(cur_decoder_output).reshape(-1, H).astype(enc.dtype)
    B = dec.shape[0]
    out_shapes = (jax.ShapeDtypeStruct((B, L), jnp.float32),
                  jax.ShapeDtypeStruct((B, L), jnp.float32))
    vmem = pltpu.MemorySpace.VMEM

    enc_bytes = L * H * enc.dtype.itemsize
    if enc_bytes <= _SINGLE_BLOCK_ENC_BYTES:
        # Whole problem in one VMEM block: fused scores + softmax, one kernel.
        return pl.pallas_call(
            _dot_fused_kernel,
            out_shape=out_shapes,
            in_specs=[pl.BlockSpec(memory_space=vmem),
                      pl.BlockSpec(memory_space=vmem)],
            out_specs=(pl.BlockSpec(memory_space=vmem),
                       pl.BlockSpec(memory_space=vmem)),
            compiler_params=pltpu.CompilerParams(
                vmem_limit_bytes=_VMEM_LIMIT_BYTES),
        )(dec, enc)

    # Large L: one fused streaming kernel.  enc tiles are double-buffered by
    # Pallas; scores, aw, law stay resident in VMEM; epilogue normalizes.
    # TODO(synk): for extremely long sequences (Lpad * ~160 bytes of resident
    # VMEM when B=1) switch to a two-pass scheme or batch B>=8 queries.
    tile = _stream_tile_rows(H, enc.dtype.itemsize)
    nt = pl.cdiv(L, tile)
    lpad = nt * tile
    aw3, law3 = pl.pallas_call(
        functools.partial(_dot_stream_kernel, length=L, tile=tile),
        out_shape=(jax.ShapeDtypeStruct((nt, B, tile), jnp.float32),
                   jax.ShapeDtypeStruct((nt, B, tile), jnp.float32)),
        grid=(nt,),
        in_specs=[pl.BlockSpec((B, H), lambda i: (0, 0)),        # dec (resident)
                  pl.BlockSpec((tile, H), lambda i: (i, 0))],    # enc (streamed)
        out_specs=(pl.BlockSpec((nt, B, tile), lambda i: (0, 0, 0)),
                   pl.BlockSpec((nt, B, tile), lambda i: (0, 0, 0))),
        scratch_shapes=[pltpu.VMEM((nt, B, tile), jnp.float32)],
        compiler_params=pltpu.CompilerParams(
            dimension_semantics=("arbitrary",),
            vmem_limit_bytes=_VMEM_LIMIT_BYTES),
    )(dec, enc)

    # (nt, B, tile) -> (B, L): tiny XLA transpose/reshape + slice of padding.
    aw = jnp.swapaxes(aw3, 0, 1).reshape(B, lpad)[:, :L]
    law = jnp.swapaxes(law3, 0, 1).reshape(B, lpad)[:, :L]
    return aw, law


# ---------------------------------------------------------------------------
# Pure-JAX reference mirroring the PyTorch module exactly
# ---------------------------------------------------------------------------

def _reference(atten_model, enc, dec, w1, w2):
    enc = enc.astype(jnp.float32)
    dec = dec.astype(jnp.float32)
    if atten_model == "Biaffine":
        ew1 = (enc @ w1.T) @ dec          # [L]
        ew2 = enc @ w2.T                  # [L, 1]
        bi = (ew1[:, None] + ew2).T       # [1, L]
        aw = jax.nn.softmax(bi, axis=0)
        law = jax.nn.log_softmax(bi + 1e-6, axis=0)
    else:
        dp = (enc @ dec)[None, :]         # [1, L]
        aw = jax.nn.softmax(dp, axis=1)
        law = jax.nn.log_softmax(dp + 1e-6, axis=1)
    return aw, law


def _reference_batched(enc, decB):
    enc = enc.astype(jnp.float32)
    decB = decB.astype(jnp.float32)
    dp = decB @ enc.T                     # [B, L]
    return jax.nn.softmax(dp, axis=1), jax.nn.log_softmax(dp + 1e-6, axis=1)


if __name__ == "__main__":
    ok = True
    ATOL = RTOL = 5e-5

    # ---- Small shapes consistent with the module (seq=8, hidden=32). ----
    L, H = 8, 32
    key = jax.random.PRNGKey(0)
    k_enc, k_dec, k_w1, k_w2 = jax.random.split(key, 4)
    enc = jax.random.normal(k_enc, (L, H), jnp.float32)
    dec = jax.random.normal(k_dec, (H,), jnp.float32)
    bound = 1.0 / np.sqrt(H)
    w1 = jax.random.uniform(k_w1, (H, H), jnp.float32, -bound, bound)
    w2 = jax.random.uniform(k_w2, (1, H), jnp.float32, -bound, bound)

    for mode in ("Dotproduct", "Biaffine"):
        aw, law = pointer_atten(mode, enc, dec, w1, w2)
        aw = jax.block_until_ready(aw)
        law = jax.block_until_ready(law)
        aw_r, law_r = _reference(mode, enc, dec, w1, w2)
        ok &= bool(np.allclose(np.asarray(aw), np.asarray(aw_r), atol=ATOL, rtol=RTOL))
        ok &= bool(np.allclose(np.asarray(law), np.asarray(law_r), atol=ATOL, rtol=RTOL))
        ok &= (aw.shape == (1, L)) and (law.shape == (1, L))

    # ---- Batched decoder queries (roofline-moving extension), small shapes. --
    k_decb = jax.random.PRNGKey(2)
    decB = jax.random.normal(k_decb, (4, H), jnp.float32)
    awB, lawB = pointer_atten("Dotproduct", enc, decB)
    awB = jax.block_until_ready(awB)
    lawB = jax.block_until_ready(lawB)
    awB_r, lawB_r = _reference_batched(enc, decB)
    ok &= bool(np.allclose(np.asarray(awB), np.asarray(awB_r), atol=ATOL, rtol=RTOL))
    ok &= bool(np.allclose(np.asarray(lawB), np.asarray(lawB_r), atol=ATOL, rtol=RTOL))
    ok &= (awB.shape == (4, L)) and (lawB.shape == (4, L))

    # ---- Exercise the fused streaming (large-L) path with a ragged last tile.
    L2, H2 = 20000, 128        # enc ~9.8 MiB > single-block threshold
    k_enc2, k_dec2 = jax.random.split(jax.random.PRNGKey(1), 2)
    enc2 = jax.random.normal(k_enc2, (L2, H2), jnp.float32)
    dec2 = jax.random.normal(k_dec2, (H2,), jnp.float32)
    aw2, law2 = pointer_atten("Dotproduct", enc2, dec2)
    aw2 = jax.block_until_ready(aw2)
    law2 = jax.block_until_ready(law2)
    aw2_r, law2_r = _reference("Dotproduct", enc2, dec2, None, None)
    ok &= bool(np.allclose(np.asarray(aw2), np.asarray(aw2_r), atol=ATOL, rtol=RTOL))
    ok &= bool(np.allclose(np.asarray(law2), np.asarray(law2_r), atol=ATOL, rtol=RTOL))
    ok &= (aw2.shape == (1, L2)) and (law2.shape == (1, L2))

    print("KERNEL_OK" if ok else "KERNEL_MISMATCH")
</pallas_src>

<mosaic_0001>
module attributes {stable_mosaic.version = 11 : i64} {
  func.func @_dot_fused_kernel(%arg0: memref<1x32xf32, #tpu.memory_space<vmem>>, %arg1: memref<8x32xf32, #tpu.memory_space<vmem>>, %arg2: memref<1x8xf32, #tpu.memory_space<vmem>>, %arg3: memref<1x8xf32, #tpu.memory_space<vmem>>) attributes {dimension_semantics = [], scalar_prefetch = 0 : i64, scratch_operands = 0 : i64, tpu.core_type = #tpu.core_type<tc>} {
    %c0 = arith.constant 0 : index
    %c0_0 = arith.constant 0 : index
    %0 = vector.load %arg0[%c0, %c0_0] : memref<1x32xf32, #tpu.memory_space<vmem>>, vector<1x32xf32>
    %c0_1 = arith.constant 0 : index
    %c0_2 = arith.constant 0 : index
    %1 = vector.load %arg1[%c0_1, %c0_2] : memref<8x32xf32, #tpu.memory_space<vmem>>, vector<8x32xf32>
    %cst = arith.constant dense<0.000000e+00> : vector<1x8xf32>
    %2 = tpu.matmul %0, %1, %cst {dimension_numbers = #tpu.dot_dimension_numbers<[1], [1], [0], [0], [0, 0, 1, 0], [], []>} : vector<1x32xf32>, vector<8x32xf32>, vector<1x8xf32> -> vector<1x8xf32>
    %cst_3 = arith.constant dense<0xFF800000> : vector<1xf32>
    %3 = vector.multi_reduction <maximumf>, %2, %cst_3 [1] : vector<1x8xf32> to vector<1xf32>
    %4 = vector.shape_cast %3 : vector<1xf32> to vector<1x1xf32>
    %5 = vector.broadcast %4 : vector<1x1xf32> to vector<1x8xf32>
    %6 = arith.subf %2, %5 : vector<1x8xf32>
    %7 = math.exp %6 : vector<1x8xf32>
    %cst_4 = arith.constant dense<0.000000e+00> : vector<1xf32>
    %8 = vector.multi_reduction <add>, %7, %cst_4 [1] : vector<1x8xf32> to vector<1xf32>
    %9 = vector.shape_cast %8 : vector<1xf32> to vector<1x1xf32>
    %10 = vector.broadcast %9 : vector<1x1xf32> to vector<1x8xf32>
    %11 = arith.divf %7, %10 : vector<1x8xf32>
    %c0_5 = arith.constant 0 : index
    %c0_6 = arith.constant 0 : index
    %12 = vector.load %arg2[%c0_5, %c0_6] : memref<1x8xf32, #tpu.memory_space<vmem>>, vector<1x8xf32>
    tpu.vector_store %arg2[%c0_5, %c0_6], %11 {strides = array<i32>} : memref<1x8xf32, #tpu.memory_space<vmem>>, vector<1x8xf32>,
    %13 = vector.broadcast %4 : vector<1x1xf32> to vector<1x8xf32>
    %14 = arith.subf %2, %13 : vector<1x8xf32>
    %15 = math.log %9 : vector<1x1xf32>
    %16 = vector.broadcast %15 : vector<1x1xf32> to vector<1x8xf32>
    %17 = arith.subf %14, %16 : vector<1x8xf32>
    %c0_7 = arith.constant 0 : index
    %c0_8 = arith.constant 0 : index
    %18 = vector.load %arg3[%c0_7, %c0_8] : memref<1x8xf32, #tpu.memory_space<vmem>>, vector<1x8xf32>
    tpu.vector_store %arg3[%c0_7, %c0_8], %17 {strides = array<i32>} : memref<1x8xf32, #tpu.memory_space<vmem>>, vector<1x8xf32>,
    return
  }
}

</mosaic_0001>

<bundles_post_ra>
// kernel: tpu_custom_call.1
= control target key start
LH: loop header
LB: loop body
LE: loop exit
PB: predicated region body
PF: predicated region fallthrough
CT: control target
= control target key end

     0   :  { %9 = vsyncpa [#allocation3], 0  ;;  %s368_s0 = inlined_call_operand.hbm [shape: f32[1,32], index: 0, kind: input, shape index: {}]   ;;  %s369_s1 = inlined_call_operand.hbm [shape: f32[8,32], index: 1, kind: input, shape index: {}]   ;;  %s370_s2 = inlined_call_operand.hbm [shape: f32[1,8], index: 2, kind: output, shape index: {0}]   ;;  %s371_s3 = inlined_call_operand.hbm [shape: f32[1,8], index: 3, kind: output, shape index: {1}]  }
   0x1   :  { %10 = vsyncpa [#allocation6], 0 }
   0x2   :  { %11 = vsyncpa [#allocation4], 0 }
   0x3   :  { %12 = vsyncpa [#allocation9], 0  ;;  %s282_s12 = smov [#allocation2]   ;;  %s283_s14 = smov [#allocation5]  }
   0x4   :  { %s19_s13 = sshll.u32 %s282_s12, 4  ;;  %s29_s15 = sshll.u32 %s283_s14, 4  ;;  %s20_s13 = int_to_ptr.vmem [resolvable:$true] %s19_s13  ;;  %s30_s15 = int_to_ptr.vmem [resolvable:$true] %s29_s15 }
   0x5   :  { %s186_s18 = scalar_lea.hbm %s368_s0, 16 }
   0x6   :  { %p187_p0 = scmp.ne.s32.totalorder %s368_s0, %s186_s18  ;;  %p190_p1 = scmp.lt.u32.totalorder %s186_s18, %s368_s0 }
   0x8   :  { %p192_p2 = pnand %p190_p1, %p187_p0 }
   0xa   :  { %195 = shalt.err (!%p192_p2)
}
   0xb   :  { %s196_s23 = scalar_lea.vmem %s20_s13, 16  ;;  %s200_s24 = scalar_lea.vmem %s20_s13, 32 }
   0xc   :  { %p197_p3 = scmp.ne.s32.totalorder %s20_s13, %s196_s23  ;;  %p201_p4 = scmp.lt.s32.totalorder %s20_s13, %s20_s13 }
   0xd   :  { %p202_p5 = scmp.lt.s32.totalorder %s200_s24, %s196_s23 }
   0xf   :  { %p203_p6 = por %p202_p5, %p201_p4 }
  0x11   :  { %p204_p7 = pnand %p203_p6, %p197_p3 }
  0x13   :  { %207 = shalt.err (!%p204_p7)
}
  0x14   :  { %22 = dma.hbm_to_vmem [thread:$0]  %s368_s0, 16, %s20_s13, [#allocation3]  }
  0x15   :  { %s208_s29 = scalar_lea.hbm %s369_s1, 128 }
  0x16   :  { %p209_p8 = scmp.ne.s32.totalorder %s369_s1, %s208_s29  ;;  %p212_p9 = scmp.lt.u32.totalorder %s208_s29, %s369_s1 }
  0x18   :  { %p214_p10 = pnand %p212_p9, %p209_p8 }
  0x1a   :  { %217 = shalt.err (!%p214_p10)
}
  0x1b   :  { %s218_s7 = scalar_lea.vmem %s30_s15, 128  ;;  %p223_p12 = scmp.lt.s32.totalorder %s30_s15, %s30_s15 }
  0x1c   :  { %p219_p11 = scmp.ne.s32.totalorder %s30_s15, %s218_s7  ;;  %p224_p13 = scmp.lt.s32.totalorder %s218_s7, %s218_s7 }
  0x1e   :  { %p225_p0 = por %p224_p13, %p223_p12 }
  0x20   :  { %p226_p1 = pnand %p225_p0, %p219_p11 }
  0x22   :  { %229 = shalt.err (!%p226_p1)
}
  0x23   :  { %32 = dma.hbm_to_vmem [thread:$0]  %s369_s1, 128, %s30_s15, [#allocation6]  }
  0x24   :  { %274 = dma.done.wait [#allocation3], 16  }
  0x25   :  { %275 = vsyncadd [#allocation3], 4294967280 }
  0x26   :  { %276 = dma.done.wait [#allocation6], 128  }
  0x27   :  { %277 = vsyncadd [#allocation6], 4294967168  ;;  %v284_v0 = vmov 0.0   ;;  %vm285_vm0 = vmmov 0   ;;  %vm41_vm1 = vcmask 261120   ;;  %v40_v1 = vld [vmem:[#allocation5] sm:$0xff] }
  0x28   :  { %169 = vmatprep.subr.mxu0 %v284_v0  ;;  %171 = vmatprep.mubr.msk.f32.mxu0 %vm285_vm0, %v284_v0  ;;  %v39_v2 = vld [vmem:[#allocation2] sm:$0x1]  ;;  %vm118_vm2 = vcmask 57344   ;;  %s286_s1 = smov [#allocation7]   ;;  %s287_s10 = smov [#allocation8]  }
  0x29   :  { %170 = vmatpush3.xpose.msk.msra.mxu0 %vm41_vm1, %v40_v1  ;;  %s141_s9 = sshll.u32 %s286_s1, 4  ;;  %s151_s11 = sshll.u32 %s287_s10, 4  ;;  %s142_s9 = int_to_ptr.vmem [resolvable:$true] %s141_s9  ;;  %s335_s11 = int_to_ptr.vmem [resolvable:$true] %s151_s11 }
  0x2a   :  { %s230_s12 = scalar_lea.vmem %s142_s9, 16  ;;  %s234_s13 = scalar_lea.vmem %s142_s9, 32 }
  0x2b   :  { %p231_p2 = scmp.ne.s32.totalorder %s142_s9, %s230_s12  ;;  %p235_p3 = scmp.lt.s32.totalorder %s142_s9, %s142_s9 }
  0x2c   :  { %172 = vmatmul.mubr.msk.f32.vlgmr.msra.gmra.mrb[0].mxu0 %vm41_vm1, %v39_v2  ;;  %p236_p4 = scmp.lt.s32.totalorder %s234_s13, %s230_s12 }
  0x2e   :  { %p237_p5 = por %p236_p4, %p235_p3 }
  0x30   :  { %p238_p6 = pnand %p237_p5, %p231_p2 }
  0xff   :  { %v114_v3 = vpop.f32.mrb[0].mxu0 }
 0x100   :  { %v173_v4 = vpop.f32.mrb[1].mxu0  ;;  %v119_v5 = vsel %vm118_vm2, %v114_v3, -inf }
 0x101   :  { %120 = vmax.xlane.f32.xlu0 %v119_v5 }
 0x18e   :  { %v121_v6 = vpop.xlane.xlu0 %120 }
 0x18f   :  { %v122_v7 = vsub.f32 %v114_v3, %v121_v6 }
 0x191   :  { %v123_v8 = vmul.f32 1.442695, %v122_v7 }
 0x193   :  { %180 = vpow2.f32 %v123_v8 }
 0x19d   :  { %v181_v9 = vpop.eup %180 }
 0x19e   :  { %v125_v10 = vsel %vm118_vm2, %v181_v9, 0.0 }
 0x19f   :  { %126 = vadd.xlane.f32.xlu0 %v125_v10 }
 0x22c   :  { %v127_v11 = vpop.xlane.xlu0 %126 }
 0x22d   :  { %182 = vrcp.f32 %v127_v11 }
 0x22e   :  { %184 = vlog2.f32 %v127_v11 }
 0x237   :  { %v183_v12 = vpop.eup %182 }
 0x238   :  { %v185_v13 = vpop.eup %184  ;;  %v129_v14 = vmul.f32 %v183_v12, %v181_v9 }
 0x239   :  { %v132_v15 = vmul.f32 0.6931472, %v185_v13 }
 0x23a   :  { %130 = vst.msk [vmem:[#allocation7] sm:$0x1] %vm118_vm2, %v129_v14 }
 0x23b   :  { %v133_v16 = vsub.f32 %v122_v7, %v132_v15 }
 0x23c   :  { %241 = shalt.err (!%p238_p6)
}
 0x23d   :  { %s242_s16 = scalar_lea.hbm %s370_s2, 16 }
 0x23e   :  { %p243_p7 = scmp.ne.s32.totalorder %s370_s2, %s242_s16  ;;  %p246_p8 = scmp.lt.u32.totalorder %s242_s16, %s370_s2 }
 0x240   :  { %p248_p9 = pnand %p246_p8, %p243_p7 }
 0x242   :  { %251 = shalt.err (!%p248_p9)
}
 0x243   :  { %144 = dma.vmem_to_hbm [thread:$0]  %s142_s9, 16, %s370_s2, [#allocation4]   ;;  %134 = vst.msk [vmem:[#allocation8] sm:$0x1] %vm118_vm2, %v133_v16 }
 0x244   :  { %s252_s23 = scalar_lea.vmem %s335_s11, 16  ;;  %s256_s24 = scalar_lea.vmem %s335_s11, 32 }
 0x245   :  { %p253_p10 = scmp.ne.s32.totalorder %s335_s11, %s252_s23  ;;  %p257_p11 = scmp.lt.s32.totalorder %s335_s11, %s335_s11 }
 0x246   :  { %p258_p12 = scmp.lt.s32.totalorder %s256_s24, %s252_s23 }
 0x248   :  { %p259_p13 = por %p258_p12, %p257_p11 }
 0x24a   :  { %p260_p0 = pnand %p259_p13, %p253_p10 }
 0x24c   :  { %263 = shalt.err (!%p260_p0)
}
 0x24d   :  { %s264_s27 = scalar_lea.hbm %s371_s3, 16 }
 0x24e   :  { %p265_p1 = scmp.ne.s32.totalorder %s371_s3, %s264_s27  ;;  %p268_p2 = scmp.lt.u32.totalorder %s264_s27, %s371_s3 }
 0x250   :  { %p270_p3 = pnand %p268_p2, %p265_p1 }
 0x252   :  { %273 = shalt.err (!%p270_p3)
}
 0x253   :  { %154 = dma.vmem_to_hbm [thread:$0]  %s335_s11, 16, %s371_s3, [#allocation9]  }
 0x254   :  { %278 = dma.done.wait [#allocation4], 16  }
 0x255   :  { %279 = vsyncadd [#allocation4], 4294967280 }
 0x256   :  { %280 = dma.done.wait [#allocation9], 16  }
 0x257   :  { %281 = vsyncadd [#allocation9], 4294967280 }
 0x258   :  { %161 = vsyncpa [#allocation3], 1 }
 0x259   :  { %162 = vsyncpa [#allocation6], 1 }
 0x25a   :  { %163 = vsyncpa [#allocation4], 1 }
 0x25b   :  { %164 = vsyncpa [#allocation9], 1 }

</bundles_post_ra>
